<compile_context>
chip_gen: v7x
topology: tpu7x:2x2x1
jax: 0.10.0
libtpu: 0.0.40
codegen_flags: <defaults>
</compile_context>

<pallas_src>
import functools

import jax
import jax.numpy as jnp
import numpy as np
from jax.experimental import pallas as pl
from jax.experimental.pallas import tpu as pltpu


def _cfconv_kernel(gamma, r_ref, idx_i_ref, idx_j_ref, x_ref, centers_ref,
                   w1_ref, w2_ref, o_ref):
    TP = r_ref.shape[0]
    N = x_ref.shape[0]

    # --- Radial basis expansion: (TP,1) - (1,n_rbf) -> (TP, n_rbf), f32 ---
    diff = r_ref[...] - centers_ref[...]
    rbf = jnp.exp(-gamma * diff * diff)

    # --- Filter-generating MLP (Dropout = identity in eval mode), f32 ---
    h = jnp.tanh(jnp.dot(rbf, w1_ref[...], preferred_element_type=jnp.float32))
    wij = jnp.tanh(jnp.dot(h, w2_ref[...], preferred_element_type=jnp.float32))   # (TP, D)

    # --- Gather X[idx_j]: bf16 one-hot (TP, N) @ bf16 X (N, D), f32 accumulate ---
    # X is already bf16 (cast hoisted to the wrapper); padded idx_j == -1 rows give 0.
    gather_iota = jax.lax.broadcasted_iota(jnp.int32, (TP, N), 1)
    gather_oh = (idx_j_ref[...] == gather_iota).astype(jnp.bfloat16)               # (TP, N)
    x_j = jnp.dot(gather_oh, x_ref[...], preferred_element_type=jnp.float32)       # (TP, D)

    # --- Continuous convolution: elementwise filter (kept in f32, no 2nd rounding) ---
    x_ij = x_j * wij                                                               # (TP, D)

    # --- scatter_add over idx_i: (N, TP) f32 one-hot @ (TP, D) f32, standard matmul ---
    scatter_iota = jax.lax.broadcasted_iota(jnp.int32, (N, TP), 0)
    scatter_oh = (idx_i_ref[...] == scatter_iota).astype(jnp.float32)              # (N, TP)
    partial = jnp.dot(scatter_oh, x_ij, preferred_element_type=jnp.float32)        # (N, D)

    p = pl.program_id(1)

    @pl.when(p == 0)
    def _():
        o_ref[...] = partial          # first tile of this core's slab: direct write

    @pl.when(p > 0)
    def _():
        o_ref[...] += partial         # later tiles: accumulate into resident block


def _round_up(x, m):
    return ((x + m - 1) // m) * m


def _vmem_limit_bytes():
    """Generation-aware VMEM budget: ~3/4 of physical, capped at 100 MiB."""
    try:
        info = pltpu.get_tpu_info()
        cap = int(getattr(info, "vmem_capacity_bytes", 0) or 0)
        if cap <= 0:
            return 64 * 1024 * 1024
        return min((cap * 3) // 4, 100 * 1024 * 1024)
    except Exception:
        return 64 * 1024 * 1024


def cfconv_dropout(X, R_distances, idx_i, idx_j, centers, W1, W2,
                   gamma=10.0, pair_tile=512, core_splits=2):
    """X: [N, D] f32, R_distances: [P] f32, idx_i/idx_j: [P] int,
    centers: [n_rbf] f32, W1: [n_rbf, D], W2: [D, D] (torch Linear weight transposed)."""
    N, D = X.shape
    P = R_distances.shape[0]
    n_rbf = centers.shape[0]

    # Pair tile: multiple of 128 (idx_i is streamed lane-major), no larger than needed.
    TP = max(128, (int(pair_tile) // 128) * 128)
    TP = min(TP, _round_up(max(P, 1), 128))
    tiles_per_split = pl.cdiv(pl.cdiv(P, TP), core_splits)
    P_pad = core_splits * tiles_per_split * TP

    # Pad pairs: padded indices are -1 (never match the non-negative iota -> contribute 0).
    r2 = jnp.zeros((P_pad, 1), jnp.float32).at[:P, 0].set(R_distances.astype(jnp.float32))
    ii = jnp.full((1, P_pad), -1, jnp.int32).at[0, :P].set(idx_i.astype(jnp.int32))   # lane-major
    ij = jnp.full((P_pad, 1), -1, jnp.int32).at[:P, 0].set(idx_j.astype(jnp.int32))   # sublane-major
    c2 = centers.reshape(1, n_rbf).astype(jnp.float32)
    x_bf16 = X.astype(jnp.bfloat16)      # hoisted cast (was re-done on-chip every tile)

    flops = P_pad * (4 * N * D + 2 * (n_rbf * D + D * D))
    transcendentals = P_pad * (n_rbf + 2 * D)
    bytes_accessed = (P_pad * 12 + N * D * 2 + core_splits * N * D * 4
                      + n_rbf * 4 + n_rbf * D * 4 + D * D * 4)

    def pair_sublane(c, p):          # (P_pad, 1) streams: r, idx_j
        return (c * tiles_per_split + p, 0)

    def pair_lane(c, p):             # (1, P_pad) stream: idx_i
        return (0, c * tiles_per_split + p)

    out = pl.pallas_call(
        functools.partial(_cfconv_kernel, float(gamma)),   # python float: baked in
        out_shape=jax.ShapeDtypeStruct((core_splits, N, D), jnp.float32),
        grid=(core_splits, tiles_per_split),
        in_specs=[
            pl.BlockSpec((TP, 1), pair_sublane),            # r tile
            pl.BlockSpec((1, TP), pair_lane),               # idx_i tile (lane-major)
            pl.BlockSpec((TP, 1), pair_sublane),            # idx_j tile
            pl.BlockSpec((N, D), lambda c, p: (0, 0)),      # X (resident, bf16)
            pl.BlockSpec((1, n_rbf), lambda c, p: (0, 0)),  # centers (resident)
            pl.BlockSpec((n_rbf, D), lambda c, p: (0, 0)),  # W1 (resident)
            pl.BlockSpec((D, D), lambda c, p: (0, 0)),      # W2 (resident)
        ],
        # Per-core accumulator slab; resident across the "arbitrary" pair axis.
        out_specs=pl.BlockSpec((None, N, D), lambda c, p: (c, 0, 0)),
        compiler_params=pltpu.CompilerParams(
            dimension_semantics=("parallel", "arbitrary"),
            vmem_limit_bytes=_vmem_limit_bytes(),
        ),
        cost_estimate=pl.CostEstimate(
            flops=flops,
            transcendentals=transcendentals,
            bytes_accessed=bytes_accessed,
        ),
    )(r2, ii, ij, x_bf16, c2, W1.astype(jnp.float32), W2.astype(jnp.float32))

    # Combine the per-core partial sums (negligible N*D add).
    return out.sum(axis=0)


def _reference(X, R, idx_i, idx_j, centers, W1, W2, gamma=10.0):
    diff = R[:, None] - centers[None, :]
    rbf = jnp.exp(-gamma * diff ** 2)
    wij = jnp.tanh(jnp.tanh(rbf @ W1) @ W2)
    x_ij = X[idx_j] * wij
    out = jnp.zeros_like(X)
    return out.at[idx_i].add(x_ij)


if __name__ == "__main__":
    # Small, forward-consistent shapes.
    n_atoms, D = 8, 32          # atom_embeddings_dim = 32
    n_pairs = 16                # number of (i, j) interactions
    n_rbf = 16
    rbf_min, rbf_max, gamma = 0.0, 5.0, 10.0

    key = jax.random.PRNGKey(0)
    kx, kr, ki, kj, k1, k2 = jax.random.split(key, 6)

    X = jax.random.normal(kx, (n_atoms, D), dtype=jnp.float32)
    R = jax.random.uniform(kr, (n_pairs,), dtype=jnp.float32,
                           minval=rbf_min, maxval=rbf_max)
    idx_i = jax.random.randint(ki, (n_pairs,), 0, n_atoms, dtype=jnp.int32)
    idx_j = jax.random.randint(kj, (n_pairs,), 0, n_atoms, dtype=jnp.int32)

    centers = jnp.linspace(rbf_min, rbf_max, n_rbf, dtype=jnp.float32)
    # Deterministic synthetic weights (shape (in, out): torch Linear weight transposed).
    W1 = jax.random.normal(k1, (n_rbf, D), dtype=jnp.float32) * (1.0 / jnp.sqrt(n_rbf))
    W2 = jax.random.normal(k2, (D, D), dtype=jnp.float32) * (1.0 / jnp.sqrt(D))

    out = cfconv_dropout(X, R, idx_i, idx_j, centers, W1, W2, gamma)
    out = jax.block_until_ready(out)

    ref = _reference(X, R, idx_i, idx_j, centers, W1, W2, gamma)
    # Only the gathered X rows carry bf16 rounding (scatter path stays f32).
    np.testing.assert_allclose(np.asarray(out), np.asarray(ref), rtol=1e-2, atol=1e-2)

    print("KERNEL_OK")
</pallas_src>

<mosaic_0001>
module attributes {stable_mosaic.version = 11 : i64} {
  func.func @_cfconv_kernel(%arg0: i32, %arg1: i32, %arg2: memref<128x1xf32, #tpu.memory_space<vmem>>, %arg3: memref<1x128xi32, #tpu.memory_space<vmem>>, %arg4: memref<128x1xi32, #tpu.memory_space<vmem>>, %arg5: memref<8x32xbf16, #tpu.memory_space<vmem>>, %arg6: memref<1x16xf32, #tpu.memory_space<vmem>>, %arg7: memref<16x32xf32, #tpu.memory_space<vmem>>, %arg8: memref<32x32xf32, #tpu.memory_space<vmem>>, %arg9: memref<1x8x32xf32, #tpu.memory_space<vmem>>) attributes {dimension_semantics = [#tpu.dimension_semantics<parallel>, #tpu.dimension_semantics<arbitrary>], iteration_bounds = array<i64: 2, 1>, scalar_prefetch = 0 : i64, scratch_operands = 0 : i64, tpu.core_type = #tpu.core_type<tc>, window_params = [{transform_indices = @transform_0, window_bounds = array<i64: 128, 1>}, {transform_indices = @transform_1, window_bounds = array<i64: 1, 128>}, {transform_indices = @transform_2, window_bounds = array<i64: 128, 1>}, {pipeline_mode = #tpu.pipeline_mode<synchronous>, transform_indices = @transform_3, window_bounds = array<i64: 8, 32>}, {pipeline_mode = #tpu.pipeline_mode<synchronous>, transform_indices = @transform_4, window_bounds = array<i64: 1, 16>}, {pipeline_mode = #tpu.pipeline_mode<synchronous>, transform_indices = @transform_5, window_bounds = array<i64: 16, 32>}, {pipeline_mode = #tpu.pipeline_mode<synchronous>, transform_indices = @transform_6, window_bounds = array<i64: 32, 32>}, {transform_indices = @transform_7, window_bounds = array<i64: 1, 8, 32>}]} {
    %c0 = arith.constant 0 : index
    %c0_0 = arith.constant 0 : index
    %0 = vector.load %arg2[%c0, %c0_0] : memref<128x1xf32, #tpu.memory_space<vmem>>, vector<128x1xf32>
    %c0_1 = arith.constant 0 : index
    %c0_2 = arith.constant 0 : index
    %1 = vector.load %arg6[%c0_1, %c0_2] : memref<1x16xf32, #tpu.memory_space<vmem>>, vector<1x16xf32>
    %2 = vector.broadcast %0 : vector<128x1xf32> to vector<128x16xf32>
    %3 = vector.broadcast %1 : vector<1x16xf32> to vector<128x16xf32>
    %4 = arith.subf %2, %3 : vector<128x16xf32>
    %cst = arith.constant -1.000000e+01 : f32
    %5 = vector.broadcast %cst : f32 to vector<128x16xf32>
    %6 = arith.mulf %5, %4 : vector<128x16xf32>
    %7 = arith.mulf %6, %4 : vector<128x16xf32>
    %8 = math.exp %7 : vector<128x16xf32>
    %c0_3 = arith.constant 0 : index
    %c0_4 = arith.constant 0 : index
    %9 = vector.load %arg7[%c0_3, %c0_4] : memref<16x32xf32, #tpu.memory_space<vmem>>, vector<16x32xf32>
    %cst_5 = arith.constant dense<0.000000e+00> : vector<128x32xf32>
    %10 = tpu.matmul %8, %9, %cst_5 {dimension_numbers = #tpu.dot_dimension_numbers<[1], [0], [0], [1], [0, 0, 1, 1], [], []>} : vector<128x16xf32>, vector<16x32xf32>, vector<128x32xf32> -> vector<128x32xf32>
    %11 = math.tanh %10 : vector<128x32xf32>
    %c0_6 = arith.constant 0 : index
    %c0_7 = arith.constant 0 : index
    %12 = vector.load %arg8[%c0_6, %c0_7] : memref<32x32xf32, #tpu.memory_space<vmem>>, vector<32x32xf32>
    %cst_8 = arith.constant dense<0.000000e+00> : vector<128x32xf32>
    %13 = tpu.matmul %11, %12, %cst_8 {dimension_numbers = #tpu.dot_dimension_numbers<[1], [0], [0], [1], [0, 0, 1, 1], [], []>} : vector<128x32xf32>, vector<32x32xf32>, vector<128x32xf32> -> vector<128x32xf32>
    %14 = math.tanh %13 : vector<128x32xf32>
    %15 = tpu.iota {dimensions = array<i32: 1>} : vector<128x8xi32>
    %c0_9 = arith.constant 0 : index
    %c0_10 = arith.constant 0 : index
    %16 = vector.load %arg4[%c0_9, %c0_10] : memref<128x1xi32, #tpu.memory_space<vmem>>, vector<128x1xi32>
    %17 = vector.broadcast %16 : vector<128x1xi32> to vector<128x8xi32>
    %18 = arith.cmpi eq, %17, %15 : vector<128x8xi32>
    %19 = arith.extui %18 : vector<128x8xi1> to vector<128x8xi32>
    %20 = arith.sitofp %19 : vector<128x8xi32> to vector<128x8xf32>
    %21 = arith.truncf %20 : vector<128x8xf32> to vector<128x8xbf16>
    %c0_11 = arith.constant 0 : index
    %c0_12 = arith.constant 0 : index
    %22 = vector.load %arg5[%c0_11, %c0_12] : memref<8x32xbf16, #tpu.memory_space<vmem>>, vector<8x32xbf16>
    %cst_13 = arith.constant dense<0.000000e+00> : vector<128x32xf32>
    %23 = tpu.matmul %21, %22, %cst_13 {dimension_numbers = #tpu.dot_dimension_numbers<[1], [0], [0], [1], [0, 0, 1, 1], [], []>} : vector<128x8xbf16>, vector<8x32xbf16>, vector<128x32xf32> -> vector<128x32xf32>
    %24 = arith.mulf %23, %14 : vector<128x32xf32>
    %25 = tpu.iota {dimensions = array<i32: 0>} : vector<8x128xi32>
    %c0_14 = arith.constant 0 : index
    %c0_15 = arith.constant 0 : index
    %26 = vector.load %arg3[%c0_14, %c0_15] : memref<1x128xi32, #tpu.memory_space<vmem>>, vector<1x128xi32>
    %27 = vector.broadcast %26 : vector<1x128xi32> to vector<8x128xi32>
    %28 = arith.cmpi eq, %27, %25 : vector<8x128xi32>
    %29 = arith.extui %28 : vector<8x128xi1> to vector<8x128xi32>
    %30 = arith.sitofp %29 : vector<8x128xi32> to vector<8x128xf32>
    %cst_16 = arith.constant dense<0.000000e+00> : vector<8x32xf32>
    %31 = tpu.matmul %30, %24, %cst_16 {dimension_numbers = #tpu.dot_dimension_numbers<[1], [0], [0], [1], [0, 0, 1, 1], [], []>} : vector<8x128xf32>, vector<128x32xf32>, vector<8x32xf32> -> vector<8x32xf32>
    %c0_i32 = arith.constant 0 : i32
    %32 = arith.cmpi eq, %arg1, %c0_i32 : i32
    %33 = arith.extui %32 : i1 to i32
    %c0_i32_17 = arith.constant 0 : i32
    %34 = arith.cmpi ne, %33, %c0_i32_17 : i32
    scf.if %34 {
      %c0_20 = arith.constant 0 : index
      %c0_21 = arith.constant 0 : index
      %c0_22 = arith.constant 0 : index
      %38 = vector.load %arg9[%c0_20, %c0_21, %c0_22] : memref<1x8x32xf32, #tpu.memory_space<vmem>>, vector<1x8x32xf32>
      %39 = vector.shape_cast %38 : vector<1x8x32xf32> to vector<8x32xf32>
      %40 = vector.shape_cast %31 : vector<8x32xf32> to vector<1x8x32xf32>
      tpu.vector_store %arg9[%c0_20, %c0_21, %c0_22], %40 {strides = array<i32>} : memref<1x8x32xf32, #tpu.memory_space<vmem>>, vector<1x8x32xf32>,
    } else {
    }
    %c0_i32_18 = arith.constant 0 : i32
    %35 = arith.cmpi sgt, %arg1, %c0_i32_18 : i32
    %36 = arith.extui %35 : i1 to i32
    %c0_i32_19 = arith.constant 0 : i32
    %37 = arith.cmpi ne, %36, %c0_i32_19 : i32
    scf.if %37 {
      %c0_20 = arith.constant 0 : index
      %c0_21 = arith.constant 0 : index
      %c0_22 = arith.constant 0 : index
      %38 = vector.load %arg9[%c0_20, %c0_21, %c0_22] : memref<1x8x32xf32, #tpu.memory_space<vmem>>, vector<1x8x32xf32>
      %39 = vector.shape_cast %38 : vector<1x8x32xf32> to vector<8x32xf32>
      %40 = arith.addf %39, %31 : vector<8x32xf32>
      %c0_23 = arith.constant 0 : index
      %c0_24 = arith.constant 0 : index
      %c0_25 = arith.constant 0 : index
      %41 = vector.load %arg9[%c0_23, %c0_24, %c0_25] : memref<1x8x32xf32, #tpu.memory_space<vmem>>, vector<1x8x32xf32>
      %42 = vector.shape_cast %41 : vector<1x8x32xf32> to vector<8x32xf32>
      %43 = vector.shape_cast %40 : vector<8x32xf32> to vector<1x8x32xf32>
      tpu.vector_store %arg9[%c0_23, %c0_24, %c0_25], %43 {strides = array<i32>} : memref<1x8x32xf32, #tpu.memory_space<vmem>>, vector<1x8x32xf32>,
    } else {
    }
    return
  }
  func.func @transform_0(%arg0: i32, %arg1: i32) -> (i32, i32) {
    %c1_i32 = arith.constant 1 : i32
    %0 = arith.muli %arg0, %c1_i32 : i32
    %1 = arith.addi %0, %arg1 : i32
    %c0_i32 = arith.constant 0 : i32
    %c0_i32_0 = arith.constant 0 : i32
    return %1, %c0_i32 : i32, i32
  }
  func.func @transform_1(%arg0: i32, %arg1: i32) -> (i32, i32) {
    %c1_i32 = arith.constant 1 : i32
    %0 = arith.muli %arg0, %c1_i32 : i32
    %1 = arith.addi %0, %arg1 : i32
    %c0_i32 = arith.constant 0 : i32
    %c0_i32_0 = arith.constant 0 : i32
    return %c0_i32, %1 : i32, i32
  }
  func.func @transform_2(%arg0: i32, %arg1: i32) -> (i32, i32) {
    %c1_i32 = arith.constant 1 : i32
    %0 = arith.muli %arg0, %c1_i32 : i32
    %1 = arith.addi %0, %arg1 : i32
    %c0_i32 = arith.constant 0 : i32
    %c0_i32_0 = arith.constant 0 : i32
    return %1, %c0_i32 : i32, i32
  }
  func.func @transform_3(%arg0: i32, %arg1: i32) -> (i32, i32) {
    %c0_i32 = arith.constant 0 : i32
    %c0_i32_0 = arith.constant 0 : i32
    %c0_i32_1 = arith.constant 0 : i32
    return %c0_i32, %c0_i32_0 : i32, i32
  }
  func.func @transform_4(%arg0: i32, %arg1: i32) -> (i32, i32) {
    %c0_i32 = arith.constant 0 : i32
    %c0_i32_0 = arith.constant 0 : i32
    %c0_i32_1 = arith.constant 0 : i32
    return %c0_i32, %c0_i32_0 : i32, i32
  }
  func.func @transform_5(%arg0: i32, %arg1: i32) -> (i32, i32) {
    %c0_i32 = arith.constant 0 : i32
    %c0_i32_0 = arith.constant 0 : i32
    %c0_i32_1 = arith.constant 0 : i32
    return %c0_i32, %c0_i32_0 : i32, i32
  }
  func.func @transform_6(%arg0: i32, %arg1: i32) -> (i32, i32) {
    %c0_i32 = arith.constant 0 : i32
    %c0_i32_0 = arith.constant 0 : i32
    %c0_i32_1 = arith.constant 0 : i32
    return %c0_i32, %c0_i32_0 : i32, i32
  }
  func.func @transform_7(%arg0: i32, %arg1: i32) -> (i32, i32, i32) {
    %c0_i32 = arith.constant 0 : i32
    %c0_i32_0 = arith.constant 0 : i32
    %c0_i32_1 = arith.constant 0 : i32
    return %arg0, %c0_i32, %c0_i32_0 : i32, i32, i32
  }
}

</mosaic_0001>

<bundles_post_ra>
// kernel: tpu_custom_call.1
= control target key start
LH: loop header
LB: loop body
LE: loop exit
PB: predicated region body
PF: predicated region fallthrough
CT: control target
= control target key end

     0   :  { %s3030_s0 = inlined_call_operand.hbm [shape: f32[256,1], index: 0, kind: input, shape index: {}]   ;;  %s3031_s1 = inlined_call_operand.hbm [shape: s32[1,256], index: 1, kind: input, shape index: {}]   ;;  %s3032_s2 = inlined_call_operand.hbm [shape: s32[256,1], index: 2, kind: input, shape index: {}]   ;;  %s3033_s3 = inlined_call_operand.hbm [shape: bf16[8,32], index: 3, kind: input, shape index: {}]   ;;  %s3034_s4 = inlined_call_operand.hbm [shape: f32[1,16], index: 4, kind: input, shape index: {}]   ;;  %s3035_s5 = inlined_call_operand.hbm [shape: f32[16,32], index: 5, kind: input, shape index: {}]   ;;  %s3036_s6 = inlined_call_operand.hbm [shape: f32[32,32], index: 6, kind: input, shape index: {}]   ;;  %s3037_s7 = inlined_call_operand.hbm [shape: f32[2,8,32], index: 7, kind: output, shape index: {}]  }
   0x1   :  { %3060 = sst [smem:[#allocation26_spill]] %s3031_s1 }
   0x2   :  { %3061 = sst [smem:[#allocation27_spill]] %s3033_s3 }
   0x3   :  { %3062 = sst [smem:[#allocation28_spill]] %s3035_s5 }
   0x4   :  { %12 = vsyncpa [#allocation3], 0 }
   0x5   :  { %14 = vsyncpa [#allocation3 + $0x1], 0 }
   0x6   :  { %15 = vsyncpa [#allocation6], 0 }
   0x7   :  { %17 = vsyncpa [#allocation6 + $0x1], 0 }
   0x8   :  { %18 = vsyncpa [#allocation9], 0 }
   0x9   :  { %19 = vsyncpa [#allocation12], 0 }
   0xa   :  { %20 = vsyncpa [#allocation4], 0 }
   0xb   :  { %22 = vsyncpa [#allocation4 + $0x1], 0  ;;  %s2464_s24 = smov 0   ;;  %s2466_s25 = smov 0  }
   0xc   :  { %s2468_s26 = smov 0   ;;  %s2470_s27 = smov 0  }
   0xd   :  { %s2472_s28 = smov 0   ;;  %s2474_s29 = smov 0  }
   0xe LB: > { %3063 = sst [smem:[#allocation20_spill]] %s2387_s24  ;;  %s2495_s30 = sadd.s32 4294967295, %s2407_s29   ;;  %s2407_s29 = sphi %s2474_s29, %s28_s29   ;;  %s2403_s28 = sphi %s2472_s28, %s3108_s28   ;;  %s2399_s27 = sphi %s2470_s27, %s3107_s27   ;;  %s2395_s26 = sphi %s2468_s26, %s3103_s26   ;;  %s2391_s25 = sphi %s2466_s25, %s3106_s25   ;;  %s2387_s24 = sphi %s2464_s24, %s3105_s24  }
   0xf   : > { %3064 = sst [smem:[#allocation21_spill]] %s2395_s26  ;;  %p1590_p0 = scmp.ge.s32.totalorder %s2407_s29, 1 }
  0x10   : > { %3065 = sst [smem:[#allocation22_spill]] %s2407_s29  ;;  %p3038_p1 = scmp.eq.s32.totalorder %s2495_s30, 0 }
  0x11   : > { %p239_p2 = scmp.lt.s32.totalorder %s2407_s29, 3  ;;  %s2409_s9 = smov [#allocation8]  }
  0x12   : > { %s252_s10 = sshll.u32 %s2409_s9, 4  ;;  %s2410_s11 = smov [#allocation11]   ;;  %s253_s10 = int_to_ptr.vmem [resolvable:$true] %s252_s10 }
  0x13   : > { %p2500_p3 = pnand %p1590_p0, %p239_p2  ;;  %s273_s12 = sshll.u32 %s2410_s11, 4  ;;  %s2513_s12 = int_to_ptr.vmem [resolvable:$true] %s273_s12 }
  0x14   : > { %s3068_s3 = sld [smem:[#allocation27_spill]] }
  0x15   : > { %s3066_s8 = scalar_select %p2500_p3, 1, 0 }
  0x16   : > { %p1917_p5 = pneg %p2500_p3 }
  0x18   : > { %p2509_p6 = pnand %p1917_p5, %p3038_p1 }
  0x1a   : > { %s3067_s13 = scalar_select %p2509_p6, 1, 0 }
  0x1b   : > { %s2111_s16 = scalar_lea.hbm %s3068_s3, 64  ;;  %p2523_p8 = pneg %p2509_p6 }
  0x1c   : > { %p2112_p7 = scmp.ne.s32.totalorder %s3068_s3, %s2111_s16  ;;  %p2118_p11 = scmp.lt.u32.totalorder %s2111_s16, %s3068_s3 }
  0x1d   : > { %s3069_s19 = scalar_select %p2523_p8, 1, 0 }
  0x1e   : > { %p2114_p9 = pnand %p2523_p8, %p2112_p7 }
  0x20   : > { %p2115_p10 = pneg %p2114_p9 }
  0x22   : > { %p2120_p12 = pnand %p2118_p11, %p2115_p10 }
  0x24   : > { %2123 = shalt.err (!%p2120_p12)
}
  0x25   : > { %s2124_s22 = scalar_lea.vmem %s253_s10, 64  ;;  %p2132_p5 = scmp.lt.s32.totalorder %s253_s10, %s253_s10 }
  0x26   : > { %p2125_p13 = scmp.ne.s32.totalorder %s253_s10, %s2124_s22  ;;  %p2133_p4 = scmp.lt.s32.totalorder %s2124_s22, %s2124_s22 }
  0x28   : > { %p2127_p0 = pnand %p2125_p13, %p2523_p8  ;;  %p2134_p1 = por %p2133_p4, %p2132_p5 }
  0x2a   : > { %p2128_p2 = pneg %p2127_p0 }
  0x2c   : > { %p2135_p3 = pnand %p2134_p1, %p2128_p2 }
  0x2e   : > { %2138 = shalt.err (!%p2135_p3)
}
  0x2f   : > { %1920 = dma.hbm_to_vmem [thread:$0]  (!%p2509_p6), %s3068_s3, 64, %s253_s10, [#allocation9]  }
  0x30   : > { %s3070_s5 = sld [smem:[#allocation28_spill]] }
  0x36   : > { %s2139_s15 = scalar_lea.hbm %s3070_s5, 256 }
  0x37   : > { %p2140_p7 = scmp.ne.s32.totalorder %s3070_s5, %s2139_s15  ;;  %p2146_p1 = scmp.lt.u32.totalorder %s2139_s15, %s3070_s5 }
  0x39   : > { %p2142_p9 = pnand %p2140_p7, %p2523_p8 }
  0x3b   : > { %p2143_p4 = pneg %p2142_p9 }
  0x3d   : > { %p2148_p3 = pnand %p2146_p1, %p2143_p4 }
  0x3f   : > { %2151 = shalt.err (!%p2148_p3)
}
  0x40   : > { %s2152_s10 = scalar_lea.vmem %s2513_s12, 256  ;;  %p2160_p13 = scmp.lt.s32.totalorder %s2513_s12, %s2513_s12 }
  0x41   : > { %p2153_p10 = scmp.ne.s32.totalorder %s2513_s12, %s2152_s10  ;;  %p2161_p0 = scmp.lt.s32.totalorder %s2152_s10, %s2152_s10 }
  0x43   : > { %p2155_p11 = pnand %p2153_p10, %p2523_p8  ;;  %p2162_p2 = por %p2161_p0, %p2160_p13 }
  0x45   : > { %p2156_p12 = pneg %p2155_p11 }
  0x47   : > { %p2163_p5 = pnand %p2162_p2, %p2156_p12 }
  0x49   : > { %2166 = shalt.err (!%p2163_p5)
}
  0x4a   : > { %s3040_s21 = smov 128   ;;  %s3042_s22 = smov 8  }
  0x4b   : > { %1926 = dma.hbm_to_vmem [thread:$0]  (!%p2509_p6), %s3070_s5, 256, %s2513_s12, [#allocation12], %s3040_s21, %s3040_s21, %s3042_s22  }
  0x4c   : > { %s1589_s11 = sadd.s32 4294967294, %s2407_s29   ;;  %s40_s14 = sadd.s32 1, %s2403_s28 }
  0x4d   : > { %p42_p7 = scmp.ge.s32.totalorder %s40_s14, 2  ;;  %s49_s15 = sadd.s32 1, %s2395_s26 }
  0x4e   : > { %p56_p9 = scmp.ne.s32.totalorder %s2395_s26, %s2391_s25  ;;  %p57_p4 = scmp.eq.s32.totalorder %s2407_s29, 0 }
  0x4f   : > { %s3110_s14 = smov (%p42_p7, %s40_s14), 0  ;;  %p62_p3 = scmp.ne.s32.totalorder %s2391_s25, %s2387_s24 }
  0x50   : > { %3071 = sst [smem:[#allocation23_spill]] %s3110_s14  ;;  %p2573_p1 = por %p57_p4, %p56_p9 }
  0x51   : > { %s46_s12 = ssub.s32 %s2403_s28, %s3110_s14  ;;  %p226_p10 = scmp.eq.s32.totalorder %s2495_s30, 1 }
  0x52   : > { %p47_p11 = scmp.eq.s32.totalorder %s46_s12, 0  ;;  %p3073_p12 = scmp.eq.s32.totalorder %s2495_s30, 0 }
  0x53   : > { %p2588_p0 = por %p226_p10, %p56_p9  ;;  %p232_p2 = scmp.eq.s32.totalorder %s1589_s11, 1 }
  0x54   : > { %p2584_p13 = por %p3073_p12, %p62_p3  ;;  %p1948_p7 = scmp.lt.s32.totalorder %s2407_s29, 2 }
  0x55   : > { %s3075_s18 = scalar_select %p2588_p0, 1, 0 }
  0x56   : > { %s3074_s17 = scalar_select %p2584_p13, 1, 0 }
  0x57   : > { %s2593_s20 = scalar_select %p47_p11, %s2395_s26, %s49_s15  }
  0x58   : > { %p2595_p5 = por %p232_p2, %p62_p3  ;;  %s2601_s23 = sand.u32 1, %s2395_s26  }
  0x59   : > { %3076 = sst [smem:[#allocation24_spill]] %s2593_s20  ;;  %s322_s9 = sand.u32 1, %s2407_s29  }
  0x5a   : > { %s3077_s10 = scalar_select %p2595_p5, 1, 0 }
  0x5b   : > { %p2607_p4 = pnand %p1948_p7, %p2573_p1  ;;  %s1599_s11 = sshll.u32 %s2403_s28, 4 }
  0x5c   : > { %3078 = sst [smem:[#allocation25_spill]] %s3077_s10  ;;  %s325_s5 = scalar_lea.vmem [#allocation5], %s2601_s23 }
  0x5d   : > { %s3079_s21 = scalar_select %p2607_p4, 1, 0 }
  0x5e   : > { %s3080_s1 = sld [smem:[#allocation26_spill]]  ;;  %s333_s14 = sshll.u32 %s325_s5, 4  ;;  %s2618_s14 = int_to_ptr.vmem [resolvable:$true] %s333_s14 }
  0x5f   : > { %s2620_s16 = scalar_lea.sflag [#allocation6], %s322_s9  ;;  %p2626_p1 = pneg %p2607_p4 }
  0x61   : > { %s3081_s20 = scalar_select %p2626_p1, 1, 0 }
  0x64   : > { %s2615_s3 = scalar_lea.hbm %s3080_s1, %s1599_s11  ;;  %s2172_s15 = scalar_lea.hbm %s3080_s1, 32 }
  0x65   : > { %s2167_s12 = scalar_lea.hbm %s2615_s3, 16  ;;  %p2173_p11 = scmp.lt.u32.totalorder %s2615_s3, %s3080_s1 }
  0x66   : > { %p2168_p9 = scmp.ne.s32.totalorder %s2615_s3, %s2167_s12  ;;  %p2174_p12 = scmp.lt.u32.totalorder %s2172_s15, %s2167_s12 }
  0x67   : > { %p2176_p7 = scmp.lt.u32.totalorder %s2167_s12, %s2615_s3 }
  0x68   : > { %p2170_p3 = pnand %p2626_p1, %p2168_p9  ;;  %p2175_p2 = por %p2174_p12, %p2173_p11 }
  0x6a   : > { %p2171_p10 = pneg %p2170_p3  ;;  %p2177_p5 = por %p2176_p7, %p2175_p2 }
  0x6c   : > { %p2178_p0 = pnand %p2177_p5, %p2171_p10 }
  0x6e   : > { %2181 = shalt.err (!%p2178_p0)
}
  0x6f   : > { %s2182_s9 = scalar_lea.vmem %s2618_s14, 16  ;;  %s2413_s22 = smov [#allocation5]  }
  0x70   : > { %p2183_p9 = scmp.ne.s32.totalorder %s2618_s14, %s2182_s9  ;;  %s2187_s11 = sshll.u32 %s2413_s22, 4  ;;  %s2188_s11 = int_to_ptr.vmem [resolvable:$false] %s2187_s11 }
  0x71   : > { %s2189_s26 = scalar_lea.vmem %s2188_s11, 32  ;;  %p2190_p6 = scmp.lt.s32.totalorder %s2618_s14, %s2188_s11 }
  0x72   : > { %p2185_p3 = pnand %p2183_p9, %p2626_p1  ;;  %p2191_p8 = scmp.lt.s32.totalorder %s2189_s26, %s2182_s9 }
  0x74   : > { %p2186_p13 = pneg %p2185_p3  ;;  %p2192_p11 = por %p2191_p8, %p2190_p6 }
  0x76   : > { %p2193_p12 = pnand %p2192_p11, %p2186_p13 }
  0x78   : > { %2196 = shalt.err (!%p2193_p12)
}
  0x79   : > { %1936 = dma.hbm_to_vmem [thread:$0]  (!%p2607_p4), %s2615_s3, 16, %s2618_s14, %s2620_s16  }
  0x7a   : > { %s3082_s12 = sshll.u32 %s2601_s23, 7  ;;  %s2414_s22 = smov [#allocation10]  }
  0x7b   : > { %s344_s15 = scalar_lea.vmem [#allocation7], %s3082_s12  ;;  %s263_s1 = sshll.u32 %s2414_s22, 4  ;;  %s264_s1 = int_to_ptr.vmem [resolvable:$true] %s263_s1 }
  0x7c   : > { %s352_s5 = sshll.u32 %s344_s15, 4  ;;  %s2197_s26 = scalar_lea.hbm %s3034_s4, 16  ;;  %s2652_s5 = int_to_ptr.vmem [resolvable:$true] %s352_s5 }
  0x7d   : > { %p2198_p6 = scmp.ne.s32.totalorder %s3034_s4, %s2197_s26  ;;  %p3083_p8 = scmp.ne.s32.totalorder %s3069_s19, 0 }
  0x7e   : > { %p2204_p5 = scmp.lt.u32.totalorder %s2197_s26, %s3034_s4 }
  0x7f   : > { %p2200_p13 = pnand %p2198_p6, %p3083_p8 }
  0x81   : > { %p2201_p0 = pneg %p2200_p13 }
  0x83   : > { %p2206_p10 = pnand %p2204_p5, %p2201_p0 }
  0x85   : > { %2209 = shalt.err (!%p2206_p10)
}
  0x86   : > { %s2210_s12 = scalar_lea.vmem %s264_s1, 16  ;;  %s2217_s15 = scalar_lea.vmem %s264_s1, 32 }
  0x87   : > { %p2211_p2 = scmp.ne.s32.totalorder %s264_s1, %s2210_s12  ;;  %p2218_p3 = scmp.lt.s32.totalorder %s264_s1, %s264_s1 }
  0x88   : > { %p2219_p11 = scmp.lt.s32.totalorder %s2217_s15, %s2210_s12 }
  0x89   : > { %p2213_p7 = pnand %p2211_p2, %p3083_p8 }
  0x8a   : > { %p2220_p12 = por %p2219_p11, %p2218_p3 }
  0x8b   : > { %p2214_p9 = pneg %p2213_p7 }
  0x8d   : > { %p2221_p4 = pnand %p2220_p12, %p2214_p9 }
  0x8f   : > { %2224 = shalt.err (!%p2221_p4)
}
  0x90   : > { %p3084_p6 = scmp.ne.s32.totalorder %s3067_s13, 0  ;;  %s2415_s22 = smov [#allocation13]  }
  0x91   : > { %s286_s9 = sshll.u32 %s2415_s22, 4  ;;  %s2225_s3 = scalar_lea.hbm %s3036_s6, 512  ;;  %s287_s9 = int_to_ptr.vmem [resolvable:$true] %s286_s9 }
  0x92   : > { %1923 = dma.hbm_to_vmem [thread:$0]  (!%p3084_p6), %s3034_s4, 16, %s264_s1, [#allocation9]  }
  0x93   : > { %p2226_p13 = scmp.ne.s32.totalorder %s3036_s6, %s2225_s3  ;;  %p2232_p5 = scmp.lt.u32.totalorder %s2225_s3, %s3036_s6 }
  0x95   : > { %p2228_p4 = pnand %p2226_p13, %p3083_p8 }
  0x97   : > { %p2229_p0 = pneg %p2228_p4 }
  0x99   : > { %p2234_p10 = pnand %p2232_p5, %p2229_p0 }
  0x9b   : > { %2237 = shalt.err (!%p2234_p10)
}
  0x9c   : > { %s2238_s1 = scalar_lea.vmem %s287_s9, 512  ;;  %p2246_p3 = scmp.lt.s32.totalorder %s287_s9, %s287_s9 }
  0x9d   : > { %p2239_p2 = scmp.ne.s32.totalorder %s287_s9, %s2238_s1  ;;  %p2247_p11 = scmp.lt.s32.totalorder %s2238_s1, %s2238_s1 }
  0x9f   : > { %p2241_p7 = pnand %p2239_p2, %p3083_p8  ;;  %p2248_p12 = por %p2247_p11, %p2246_p3 }
  0xa1   : > { %p2242_p9 = pneg %p2241_p7 }
  0xa3   : > { %p2249_p1 = pnand %p2248_p12, %p2242_p9 }
  0xa5   : > { %2252 = shalt.err (!%p2249_p1)
}
  0xa6   : > { %s3085_s24 = smov 8   ;;  %s3086_s29 = smov 128  }
  0xa7   : > { %1929 = dma.hbm_to_vmem [thread:$0]  (!%p3084_p6), %s3036_s6, 512, %s287_s9, [#allocation12], %s3086_s29, %s3086_s29, %s3085_s24  }
  0xa8   : > { %s1675_s19 = sshll.u32 %s2403_s28, 11  ;;  %s3087_s11 = sshll.u32 %s2601_s23, 7 }
  0xa9   : > { %s304_s26 = scalar_lea.vmem [#allocation2], %s3087_s11  ;;  %s2701_s13 = scalar_lea.hbm %s3030_s0, %s1675_s19 }
  0xaa   : > { %s312_s3 = sshll.u32 %s304_s26, 4  ;;  %s301_s15 = scalar_lea.sflag [#allocation3], %s2601_s23  ;;  %s2703_s3 = int_to_ptr.vmem [resolvable:$true] %s312_s3 }
  0xab   : > { %s2253_s1 = scalar_lea.hbm %s2701_s13, 2048  ;;  %p3088_p8 = scmp.ne.s32.totalorder %s3081_s20, 0 }
  0xac   : > { %p2254_p1 = scmp.ne.s32.totalorder %s2701_s13, %s2253_s1  ;;  %s2258_s22 = scalar_lea.hbm %s3030_s0, 4096 }
  0xad   : > { %p2259_p4 = scmp.lt.u32.totalorder %s2701_s13, %s3030_s0  ;;  %p2260_p0 = scmp.lt.u32.totalorder %s2258_s22, %s2253_s1 }
  0xae   : > { %p2256_p6 = pnand %p2254_p1, %p3088_p8  ;;  %p2262_p10 = scmp.lt.u32.totalorder %s2253_s1, %s2701_s13 }
  0xaf   : > { %p2261_p5 = por %p2260_p0, %p2259_p4 }
  0xb0   : > { %p2257_p13 = pneg %p2256_p6 }
  0xb1   : > { %p2263_p2 = por %p2262_p10, %p2261_p5 }
  0xb3   : > { %p2264_p7 = pnand %p2263_p2, %p2257_p13 }
  0xb5   : > { %2267 = shalt.err (!%p2264_p7)
}
  0xb6   : > { %s2268_s14 = scalar_lea.vmem %s2703_s3, 2048  ;;  %s2416_s12 = smov [#allocation2]  }
  0xb7   : > { %p2269_p9 = scmp.ne.s32.totalorder %s2703_s3, %s2268_s14  ;;  %s2273_s9 = sshll.u32 %s2416_s12, 4  ;;  %s2274_s9 = int_to_ptr.vmem [resolvable:$false] %s2273_s9 }
  0xb8   : > { %s2275_s10 = scalar_lea.vmem %s2274_s9, 4096  ;;  %p2276_p12 = scmp.lt.s32.totalorder %s2703_s3, %s2274_s9 }
  0xb9   : > { %p2271_p3 = pnand %p2269_p9, %p3088_p8  ;;  %p2277_p1 = scmp.lt.s32.totalorder %s2275_s10, %s2268_s14 }
  0xbb   : > { %p2272_p11 = pneg %p2271_p3  ;;  %p2278_p6 = por %p2277_p1, %p2276_p12 }
  0xbd   : > { %p2279_p4 = pnand %p2278_p6, %p2272_p11 }
  0xbf   : > { %2282 = shalt.err (!%p2279_p4)
}
  0xc0   : > { %p3089_p13 = scmp.ne.s32.totalorder %s3079_s21, 0  ;;  %s2737_s11 = scalar_lea.hbm %s3032_s2, %s1675_s19 }
  0xc1   : > { %s2283_s26 = scalar_lea.hbm %s2737_s11, 2048  ;;  %s2288_s12 = scalar_lea.hbm %s3032_s2, 4096 }
  0xc2   : > { %1933 = dma.hbm_to_vmem [thread:$0]  (!%p3089_p13), %s2701_s13, 2048, %s2703_s3, %s301_s15, %s3086_s29, %s3086_s29, %s3085_s24  }
  0xc3   : > { %p2284_p0 = scmp.ne.s32.totalorder %s2737_s11, %s2283_s26  ;;  %p2289_p2 = scmp.lt.u32.totalorder %s2737_s11, %s3032_s2 }
  0xc4   : > { %p2290_p7 = scmp.lt.u32.totalorder %s2288_s12, %s2283_s26  ;;  %p2292_p3 = scmp.lt.u32.totalorder %s2283_s26, %s2737_s11 }
  0xc5   : > { %p2286_p5 = pnand %p2284_p0, %p3088_p8 }
  0xc6   : > { %p2291_p9 = por %p2290_p7, %p2289_p2 }
  0xc7   : > { %p2287_p10 = pneg %p2286_p5 }
  0xc8   : > { %p2293_p11 = por %p2292_p3, %p2291_p9 }
  0xca   : > { %p2294_p12 = pnand %p2293_p11, %p2287_p10 }
  0xcc   : > { %2297 = shalt.err (!%p2294_p12)
}
  0xcd   : > { %s2298_s19 = scalar_lea.vmem %s2652_s5, 2048  ;;  %s2417_s15 = smov [#allocation7]  }
  0xce   : > { %p2299_p1 = scmp.ne.s32.totalorder %s2652_s5, %s2298_s19  ;;  %s2303_s9 = sshll.u32 %s2417_s15, 4  ;;  %s2304_s9 = int_to_ptr.vmem [resolvable:$false] %s2303_s9 }
  0xcf   : > { %s2305_s10 = scalar_lea.vmem %s2304_s9, 4096  ;;  %p2306_p0 = scmp.lt.s32.totalorder %s2652_s5, %s2304_s9 }
  0xd0   : > { %p2301_p6 = pnand %p2299_p1, %p3088_p8  ;;  %p2307_p5 = scmp.lt.s32.totalorder %s2305_s10, %s2298_s19 }
  0xd2   : > { %p2302_p4 = pneg %p2301_p6  ;;  %p2308_p2 = por %p2307_p5, %p2306_p0 }
  0xd4   : > { %p2309_p7 = pnand %p2308_p2, %p2302_p4 }
  0xd6   : > { %2312 = shalt.err (!%p2309_p7)
}
  0xd7   : > { %1939 = dma.hbm_to_vmem [thread:$0]  (!%p3089_p13), %s2737_s11, 2048, %s2652_s5, %s2620_s16, %s3086_s29, %s3086_s29, %s3085_s24  }
  0xd8   : > { %p3090_p8 = scmp.ne.s32.totalorder %s3066_s8, 0 }
  0xd9   : > { %s2767_s20 = sand.u32 (!%p3090_p8), 1, %s2391_s25   ;;  %p3091_p10 = scmp.ne.s32.totalorder (!%p3090_p8), %s3074_s17, 0 }
  0xda   : > { %364 = sbr.rel (%p3090_p8) target bundleno = 1099 (0x44b), region = 48  ;;  %s1604_s1 = sshll.u32 (!%p3090_p8), %s2767_s20, 7 }
  0xdb   : > { %s367_s22 = scalar_lea.sflag (!%p3090_p8), [#allocation3], %s2767_s20  ;;  %s2771_s26 = scalar_lea.vmem (!%p3090_p8), [#allocation2], %s1604_s1 }
  0xe1   : > { %2366 = dma.done.wait (%p3091_p10), %s367_s22, 2048  }
  0xe2   : > { %2368 = vsyncadd (%p3091_p10), %s367_s22, 4294965248  ;;  %s375_s8 = sand.u32 1, %s2495_s30   ;;  %s378_s16 = scalar_lea.vmem [#allocation5], %s2767_s20 }
  0xe3   : > { %s376_s21 = scalar_lea.sflag [#allocation6], %s375_s8 }
  0xe4   : > { %2370 = dma.done.wait (%p3091_p10), %s376_s21, 2064  }
  0xe5   : > { %2372 = vsyncadd (%p3091_p10), %s376_s21, 4294965232  ;;  %s2783_s5 = scalar_lea.vmem [#allocation7], %s1604_s1  ;;  %p3092_p13 = scmp.eq.s32.totalorder %s2495_s30, 0 }
  0xe7   : > { %2374 = dma.done.wait (%p3092_p13), [#allocation9], 80   ;;  %p3093_p9 = pmov %p3092_p13 }
  0xe9   : > { %2376 = vsyncadd (%p3093_p9), [#allocation9], 4294967216  ;;  %p3094_p3 = pmov %p3093_p9 }
  0xeb   : > { %2378 = dma.done.wait (%p3094_p3), [#allocation12], 768   ;;  %p3095_p11 = pmov %p3094_p3 }
  0xec   : > { %v2418_v0 = vmov 0   ;;  %v451_v1 = vld [vmem:[%s2771_s26 + $0x10] sm:$0xff]  ;;  %v449_v2 = vld [vmem:[%s2771_s26] sm:$0xff]  ;;  %v452_v3 = vld [vmem:[%s2771_s26 + $0x18] sm:$0xff]  ;;  %vm1206_vm0 = vcmask 1043456   ;;  %vm634_vm1 = vcmask 130048  }
  0xed   : > { %2380 = vsyncadd (%p3095_p11), [#allocation12], 4294966528  ;;  %2014 = vset.pattern.permute.xlu1 %v2418_v0  ;;  %2013 = vset.pattern.permute.xlu0 %v2418_v0  ;;  %v450_v4 = vld [vmem:[%s2771_s26 + $0x8] sm:$0xff]  ;;  %v453_v6 = vld [vmem:[%s2771_s26 + $0x20] sm:$0xff]  ;;  %vm1181_vm6 = vcmask 64512   ;;  %s1610_s30 = sshll.u32 %s2767_s20, 3 }
  0xee   : > { %478 = vperm.xlu1 %2014, %v451_v1   ;;  %468 = vperm.xlu0 %2013, %v449_v2   ;;  %v454_v5 = vld [vmem:[%s2771_s26 + $0x28] sm:$0xff]  ;;  %v456_v7 = vld [vmem:[%s2771_s26 + $0x38] sm:$0xff]  ;;  %v455_v8 = vld [vmem:[%s2771_s26 + $0x30] sm:$0xff]  ;;  %s1672_s17 = sshll.u32 %s2399_s27, 7  ;;  %s442_s24 = scalar_lea.vmem [#allocation14], %s1610_s30 }
  0xef   : > { %v458_v9 = vld [vmem:[%s2771_s26 + $0x48] sm:$0xff]  ;;  %v457_v10 = vld [vmem:[%s2771_s26 + $0x40] sm:$0xff]  ;;  %v460_v11 = vld [vmem:[%s2771_s26 + $0x58] sm:$0xff]  ;;  %s1429_s29 = sshll.u32 %s442_s24, 4  ;;  %s2980_s14 = scalar_lea.hbm %s3037_s7, %s1672_s17  ;;  %s2982_s29 = int_to_ptr.vmem [resolvable:$true] %s1429_s29 }
  0xf0   : > { %v459_v12 = vld [vmem:[%s2771_s26 + $0x50] sm:$0xff]  ;;  %v632_v13 = vld [vmem:[#allocation11] sm:$0xff]  ;;  %v461_v17 = vld [vmem:[%s2771_s26 + $0x60] sm:$0xff]  ;;  %s1416_s12 = scalar_lea.sflag [#allocation4], %s2767_s20  ;;  %s2313_s3 = scalar_lea.vmem %s2982_s29, 128 }
  0xf1   : > { %v633_v14 = vld [vmem:[#allocation11 + $0x8] sm:$0xff]  ;;  %v462_v16 = vld [vmem:[%s2771_s26 + $0x68] sm:$0xff]  ;;  %v464_v18 = vld [vmem:[%s2771_s26 + $0x78] sm:$0xff]  ;;  %p2314_p12 = scmp.ne.s32.totalorder %s2982_s29, %s2313_s3  ;;  %p3096_p1 = scmp.ne.s32.totalorder %s3075_s18, 0 }
  0xf2   : > { %483 = vperm.xlu1 %2014, %v452_v3   ;;  %473 = vperm.xlu0 %2013, %v450_v4   ;;  %v1854_v15 = vpack.c.bf16 %v633_v14, %v632_v13  ;;  %v463_v19 = vld [vmem:[%s2771_s26 + $0x70] sm:$0xff]  ;;  %v1060_v21 = vld [vmem:[%s2783_s5] sm:$0xff]  ;;  %v1063_v22 = vld [vmem:[%s2783_s5 + $0x18] sm:$0xff]  ;;  %s2423_s27 = smov [#allocation14]  }
  0xf3   : > { %v1061_v20 = vld [vmem:[%s2783_s5 + $0x8] sm:$0xff]  ;;  %v1062_v23 = vld [vmem:[%s2783_s5 + $0x10] sm:$0xff]  ;;  %v1064_v25 = vld [vmem:[%s2783_s5 + $0x20] sm:$0xff]  ;;  %p2315_p6 = pnand %p2314_p12, %p3096_p1  ;;  %s2317_s13 = sshll.u32 %s2423_s27, 4  ;;  %s2318_s13 = int_to_ptr.vmem [resolvable:$false] %s2317_s13 }
  0xf4   : > { %1855 = vmatprep.subr.bf16.mxu0 %v1854_v15  ;;  %1890 = vmatprep.subr.bf16.mxu1 %v1854_v15  ;;  %v1065_v24 = vld [vmem:[%s2783_s5 + $0x28] sm:$0xff]  ;;  %v1180_v26 = vld [vmem:[#allocation8] sm:$0xf]  ;;  %v1067_v28 = vld [vmem:[%s2783_s5 + $0x38] sm:$0xff]  ;;  %s2319_s19 = scalar_lea.vmem %s2318_s13, 256  ;;  %p2320_p0 = scmp.lt.s32.totalorder %s2982_s29, %s2318_s13 }
  0xf5   : > { %1857 = vmatpush3.bf16.msra.mxu0 %v1854_v15  ;;  %1891 = vmatpush3.bf16.msra.mxu1 %v1854_v15  ;;  %v2815_v27 = vsel %vm1206_vm0, %v1180_v26, 0  ;;  %v1066_v29 = vld [vmem:[%s2783_s5 + $0x30] sm:$0xff]  ;;  %v1069_v30 = vld [vmem:[%s2783_s5 + $0x48] sm:$0xff]  ;;  %v1068_v31 = vld [vmem:[%s2783_s5 + $0x40] sm:$0xff]  ;;  %p2316_p4 = pneg %p2315_p6  ;;  %p2321_p5 = scmp.lt.s32.totalorder %s2319_s19, %s2313_s3 }
  0xf6   : > { %493 = vperm.xlu1 %2014, %v454_v5   ;;  %488 = vperm.xlu0 %2013, %v453_v6   ;;  %v1071_v32 = vld [vmem:[%s2783_s5 + $0x58] sm:$0xff]  ;;  %v1070_v33 = vld [vmem:[%s2783_s5 + $0x50] sm:$0xff]  ;;  %v1073_v34 = vld [vmem:[%s2783_s5 + $0x68] sm:$0xff] }
  0xf7   : > { %1892 = vmatprep.subr.msk.bf16.mxu0 %vm1206_vm0, %v1180_v26  ;;  %v1072_v35 = vld [vmem:[%s2783_s5 + $0x60] sm:$0xff]  ;;  %v1075_v36 = vld [vmem:[%s2783_s5 + $0x78] sm:$0xff]  ;;  %v1074_v37 = vld [vmem:[%s2783_s5 + $0x70] sm:$0xff]  ;;  %p2322_p2 = por %p2321_p5, %p2320_p0 }
  0xf8   : > { %v2827_v38 = vld [vmem:[#allocation10] ss:$0 sm:$0xff] }
  0xf9   : > { %p2323_p7 = pnand %p2322_p2, %p2316_p4 }
  0xfa   : > { %503 = vperm.xlu1 %2014, %v456_v7   ;;  %498 = vperm.xlu0 %2013, %v455_v8  }
  0xfe   : > { %513 = vperm.xlu1 %2014, %v458_v9   ;;  %508 = vperm.xlu0 %2013, %v457_v10  }
 0x102   : > { %523 = vperm.xlu1 %2014, %v460_v11   ;;  %518 = vperm.xlu0 %2013, %v459_v12  }
 0x106   : > { %533 = vperm.xlu1 %2014, %v462_v16   ;;  %528 = vperm.xlu0 %2013, %v461_v17  }
 0x10a   : > { %543 = vperm.xlu1 %2014, %v464_v18   ;;  %538 = vperm.xlu0 %2013, %v463_v19  }
 0x10e   : > { %1080 = vperm.xlu1 %2014, %v1061_v20   ;;  %1077 = vperm.xlu0 %2013, %v1060_v21  }
 0x112   : > { %1086 = vperm.xlu1 %2014, %v1063_v22   ;;  %1083 = vperm.xlu0 %2013, %v1062_v23  }
 0x116   : > { %1092 = vperm.xlu1 %2014, %v1065_v24   ;;  %1089 = vperm.xlu0 %2013, %v1064_v25  }
 0x11a   : > { %1098 = vperm.xlu1 %2014, %v1067_v28   ;;  %1095 = vperm.xlu0 %2013, %v1066_v29  }
 0x11e   : > { %1104 = vperm.xlu1 %2014, %v1069_v30   ;;  %1101 = vperm.xlu0 %2013, %v1068_v31  }
 0x122   : > { %1110 = vperm.xlu1 %2014, %v1071_v32   ;;  %1107 = vperm.xlu0 %2013, %v1070_v33  }
 0x126   : > { %1116 = vperm.xlu1 %2014, %v1073_v34   ;;  %1113 = vperm.xlu0 %2013, %v1072_v35  }
 0x12a   : > { %1122 = vperm.xlu1 %2014, %v1075_v36   ;;  %1119 = vperm.xlu0 %2013, %v1074_v37   ;;  %v1058_v36 = vlaneseq }
 0x16d   : > { %v479_v39 = vpop.permute.xlu1 %478  ;;  %v469_v40 = vpop.permute.xlu0 %468 }
 0x16e   : > { %v554_v41 = vsub.f32 %v479_v39, %v2827_v38  ;;  %v552_v42 = vsub.f32 %v469_v40, %v2827_v38 }
 0x170   : > { %v570_v43 = vmul.f32 -10.0, %v554_v41  ;;  %v568_v44 = vmul.f32 -10.0, %v552_v42 }
 0x171   : > { %v484_v45 = vpop.permute.xlu1 %483  ;;  %v474_v46 = vpop.permute.xlu0 %473 }
 0x172   : > { %v584_v47 = vmul.f32 %v568_v44, %v552_v42  ;;  %v555_v48 = vsub.f32 %v484_v45, %v2827_v38  ;;  %v553_v49 = vsub.f32 %v474_v46, %v2827_v38  ;;  %v586_v50 = vmul.f32 %v570_v43, %v554_v41 }
 0x174   : > { %v600_v51 = vmul.f32 1.442695, %v584_v47  ;;  %v571_v52 = vmul.f32 -10.0, %v555_v48  ;;  %v569_v53 = vmul.f32 -10.0, %v553_v49  ;;  %v604_v60 = vmul.f32 1.442695, %v586_v50 }
 0x175   : > { %v494_v54 = vpop.permute.xlu1 %493  ;;  %v489_v55 = vpop.permute.xlu0 %488 }
 0x176   : > { %v587_v56 = vmul.f32 %v571_v52, %v555_v48  ;;  %v585_v57 = vmul.f32 %v569_v53, %v553_v49  ;;  %v557_v58 = vsub.f32 %v494_v54, %v2827_v38  ;;  %2015 = vpow2.f32 %v600_v51 }
 0x177   : > { %v556_v59 = vsub.f32 %v489_v55, %v2827_v38  ;;  %v2848_v51 = vand.u32 127, %v1058_v36 }
 0x178   : > { %v602_v61 = vmul.f32 1.442695, %v585_v57  ;;  %v573_v62 = vmul.f32 -10.0, %v557_v58  ;;  %v606_v2 = vmul.f32 1.442695, %v587_v56 }
 0x179   : > { %v572_v63 = vmul.f32 -10.0, %v556_v59  ;;  %v504_v0 = vpop.permute.xlu1 %503  ;;  %v499_v1 = vpop.permute.xlu0 %498 }
 0x17a   : > { %v589_v3 = vmul.f32 %v573_v62, %v557_v58  ;;  %v559_v4 = vsub.f32 %v504_v0, %v2827_v38  ;;  %v558_v5 = vsub.f32 %v499_v1, %v2827_v38  ;;  %2017 = vpow2.f32 %v602_v61 }
 0x17b   : > { %v588_v6 = vmul.f32 %v572_v63, %v556_v59  ;;  %2019 = vpow2.f32 %v604_v60 }
 0x17c   : > { %v575_v7 = vmul.f32 -10.0, %v559_v4  ;;  %v574_v8 = vmul.f32 -10.0, %v558_v5  ;;  %v610_v9 = vmul.f32 1.442695, %v589_v3  ;;  %2021 = vpow2.f32 %v606_v2 }
 0x17d   : > { %v608_v10 = vmul.f32 1.442695, %v588_v6  ;;  %v514_v11 = vpop.permute.xlu1 %513  ;;  %v509_v12 = vpop.permute.xlu0 %508 }
 0x17e   : > { %v591_v13 = vmul.f32 %v575_v7, %v559_v4  ;;  %v590_v14 = vmul.f32 %v574_v8, %v558_v5  ;;  %v561_v15 = vsub.f32 %v514_v11, %v2827_v38  ;;  %v560_v16 = vsub.f32 %v509_v12, %v2827_v38 }
 0x17f   : > { %2023 = vpow2.f32 %v608_v10  ;;  %v2419_v4 = vmov 0.0  }
 0x180   : > { %v612_v17 = vmul.f32 1.442695, %v590_v14  ;;  %v577_v18 = vmul.f32 -10.0, %v561_v15  ;;  %v2016_v19 = vpop.eup %2015  ;;  %2025 = vpow2.f32 %v610_v9  ;;  %v576_v20 = vmul.f32 -10.0, %v560_v16 }
 0x181   : > { %v524_v21 = vpop.permute.xlu1 %523  ;;  %v519_v22 = vpop.permute.xlu0 %518  ;;  %v614_v23 = vmul.f32 1.442695, %v591_v13  ;;  %1745 = vmatprep.mubr.msk.f32.mxu0 %vm634_vm1, %v2016_v19 }
 0x182   : > { %v593_v24 = vmul.f32 %v577_v18, %v561_v15  ;;  %v563_v25 = vsub.f32 %v524_v21, %v2827_v38  ;;  %v562_v26 = vsub.f32 %v519_v22, %v2827_v38  ;;  %2027 = vpow2.f32 %v612_v17 }
 0x183   : > { %v592_v28 = vmul.f32 %v576_v20, %v560_v16  ;;  %2029 = vpow2.f32 %v614_v23 }
 0x184   : > { %v579_v29 = vmul.f32 -10.0, %v563_v25  ;;  %v578_v30 = vmul.f32 -10.0, %v562_v26  ;;  %v2018_v31 = vpop.eup %2017  ;;  %v618_v32 = vmul.f32 1.442695, %v593_v24 }
 0x185   : > { %v616_v33 = vmul.f32 1.442695, %v592_v28  ;;  %v534_v34 = vpop.permute.xlu1 %533  ;;  %v529_v35 = vpop.permute.xlu0 %528  ;;  %1746 = vmatmul.mubr.msk.f32.vlgmr.msra.gmra.mrb[0].mxu0 %vm634_vm1, %v2018_v31 }
 0x186   : > { %v2020_v37 = vpop.eup %2019  ;;  %v595_v39 = vmul.f32 %v579_v29, %v563_v25  ;;  %v594_v40 = vmul.f32 %v578_v30, %v562_v26  ;;  %v565_v41 = vsub.f32 %v534_v34, %v2827_v38  ;;  %v564_v42 = vsub.f32 %v529_v35, %v2827_v38  ;;  %1802 = vmatpush3.bf16.msra.mxu0 %v2815_v27 }
 0x187   : > { %2031 = vpow2.f32 %v616_v33  ;;  %1748 = vmatprep.mubr.msk.f32.mxu0 %vm634_vm1, %v2020_v37  ;;  %v2022_v43 = vpop.eup %2021 }
 0x188   : > { %v622_v44 = vmul.f32 1.442695, %v595_v39  ;;  %v620_v45 = vmul.f32 1.442695, %v594_v40  ;;  %v581_v46 = vmul.f32 -10.0, %v565_v41  ;;  %2033 = vpow2.f32 %v618_v32 }
 0x189   : > { %v2024_v47 = vpop.eup %2023  ;;  %v580_v48 = vmul.f32 -10.0, %v564_v42  ;;  %v544_v49 = vpop.permute.xlu1 %543  ;;  %1749 = vmatmul.mubr.msk.f32.gmra.mrb[2].mxu0 %vm634_vm1, %v2022_v43 }
 0x18a   : > { %v539_v50 = vpop.permute.xlu0 %538  ;;  %2035 = vpow2.f32 %v622_v44  ;;  %v597_v52 = vmul.f32 %v581_v46, %v565_v41  ;;  %v567_v53 = vsub.f32 %v544_v49, %v2827_v38  ;;  %v2026_v54 = vpop.eup %2025  ;;  %1751 = vmatprep.mubr.msk.f32.mxu0 %vm634_vm1, %v2024_v47 }
 0x18b   : > { %v566_v27 = vsub.f32 %v539_v50, %v2827_v38  ;;  %2037 = vpow2.f32 %v620_v45  ;;  %v596_v55 = vmul.f32 %v580_v48, %v564_v42 }
 0x18c   : > { %v626_v56 = vmul.f32 1.442695, %v597_v52  ;;  %v583_v57 = vmul.f32 -10.0, %v567_v53  ;;  %v2028_v59 = vpop.eup %2027 }
 0x18d   : > { %v582_v58 = vmul.f32 -10.0, %v566_v27  ;;  %v624_v60 = vmul.f32 1.442695, %v596_v55  ;;  %v1081_v61 = vpop.permute.xlu1 %1080  ;;  %1752 = vmatmul.mubr.msk.f32.gmra.mrb[4].mxu0 %vm634_vm1, %v2026_v54  ;;  %v2030_v38 = vpop.eup %2029  ;;  %v845_v54 = vld [vmem:[#allocation13 + $0x8] sm:$0xff] }
 0x18e   : > { %v1078_v62 = vpop.permute.xlu0 %1077  ;;  %2039 = vpow2.f32 %v626_v56  ;;  %v599_v63 = vmul.f32 %v583_v57, %v567_v53  ;;  %vm1125_vm2 = vcmp.eq.s32.totalorder %v1081_v61, %v2848_v51  ;;  %1754 = vmatprep.mubr.msk.f32.mxu0 %vm634_vm1, %v2028_v59  ;;  %v846_v56 = vld [vmem:[#allocation13 + $0x10] sm:$0xff]  ;;  %v847_v57 = vld [vmem:[#allocation13 + $0x18] sm:$0xff] }
 0x18f   : > { %v598_v0 = vmul.f32 %v582_v58, %v566_v27  ;;  %2041 = vpow2.f32 %v624_v60  ;;  %vm1124_vm3 = vcmp.eq.s32.totalorder %v1078_v62, %v2848_v51  ;;  %v1645_v5 = vsel %vm1125_vm2, 1.0, %v2419_v4  ;;  %v844_v27 = vld [vmem:[#allocation13] sm:$0xff] }
 0x190   : > { %v630_v1 = vmul.f32 1.442695, %v599_v63  ;;  %v1644_v8 = vsel %vm1124_vm3, 1.0, %v2419_v4  ;;  %v1858_v55 = vpack.c.bf16 %v845_v54, %v844_v27  ;;  %v1862_v58 = vpack.c.bf16 %v847_v57, %v846_v56 }
 0x191   : > { %v628_v2 = vmul.f32 1.442695, %v598_v0  ;;  %v2032_v3 = vpop.eup %2031  ;;  %v1087_v6 = vpop.permute.xlu1 %1086  ;;  %1755 = vmatmul.mubr.msk.f32.gmra.mrb[6].mxu0 %vm634_vm1, %v2030_v38  ;;  %v1172_v12 = vpack.c.bf16 %v1645_v5, %v1644_v8  ;;  %vm848_vm3 = vcmask 261120  }
 0x192   : > { %v1084_v7 = vpop.permute.xlu0 %1083  ;;  %2043 = vpow2.f32 %v630_v1  ;;  %vm1127_vm4 = vcmp.eq.s32.totalorder %v1087_v6, %v2848_v51  ;;  %v2034_v9 = vpop.eup %2033  ;;  %1757 = vmatprep.mubr.msk.f32.mxu0 %vm634_vm1, %v2032_v3  ;;  %1859 = vmatprep.subr.bf16.mxu1 %v1858_v55 }
 0x193   : > { %vm1126_vm5 = vcmp.eq.s32.totalorder %v1084_v7, %v2848_v51  ;;  %2045 = vpow2.f32 %v628_v2  ;;  %v1647_v13 = vsel %vm1127_vm4, 1.0, %v2419_v4  ;;  %vm2421_vm4 = vmmov 0  }
 0x194   : > { %v2036_v10 = vpop.eup %2035  ;;  %v1646_v14 = vsel %vm1126_vm5, 1.0, %v2419_v4 }
 0x195   : > { %v2038_v11 = vpop.eup %2037  ;;  %v1093_v15 = vpop.permute.xlu1 %1092  ;;  %1758 = vmatmul.mubr.msk.f32.gmra.mrb[8].mxu0 %vm634_vm1, %v2034_v9  ;;  %v1173_v20 = vpack.c.bf16 %v1647_v13, %v1646_v14 }
 0x196   : > { %v1090_v16 = vpop.permute.xlu0 %1089  ;;  %vm1129_vm7 = vcmp.eq.s32.totalorder %v1093_v15, %v2848_v51  ;;  %1760 = vmatprep.mubr.msk.f32.mxu1 %vm634_vm1, %v2038_v11  ;;  %1803 = vmatprep.mubr.msk.bf16.mxu0 %vm1181_vm6, %v1172_v12 }
 0x197   : > { %vm1128_vm8 = vcmp.eq.s32.totalorder %v1090_v16, %v2848_v51  ;;  %v1649_v17 = vsel %vm1129_vm7, 1.0, %v2419_v4  ;;  %1761 = vmatmul.mubr.msk.f32.vlgmr.msra.gmra.mrb[0].mxu1 %vm634_vm1, %v2036_v10 }
 0x198   : > { %v1648_v18 = vsel %vm1128_vm8, 1.0, %v2419_v4  ;;  %v2040_v19 = vpop.eup %2039  ;;  %1861 = vmatpush3.bf16.msra.mxu1 %v1858_v55 }
 0x199   : > { %v1174_v21 = vpack.c.bf16 %v1649_v17, %v1648_v18  ;;  %v2042_v22 = vpop.eup %2041  ;;  %v1099_v23 = vpop.permute.xlu1 %1098  ;;  %1804 = vmatmul.mubr.msk.bf16.vlgmr.msra.gmra.mrb[12].mxu0 %vm1181_vm6, %v1173_v20  ;;  %1863 = vmatprep.subr.bf16.mxu1 %v1862_v58 }
 0x19a   : > { %v1096_v24 = vpop.permute.xlu0 %1095  ;;  %vm1131_vm9 = vcmp.eq.s32.totalorder %v1099_v23, %v2848_v51  ;;  %1763 = vmatprep.mubr.msk.f32.mxu1 %vm634_vm1, %v2042_v22 }
 0x19b   : > { %vm1130_vm10 = vcmp.eq.s32.totalorder %v1096_v24, %v2848_v51  ;;  %1764 = vmatmul.mubr.msk.f32.gmra.mrb[2].mxu1 %vm634_vm1, %v2040_v19  ;;  %1807 = vmatprep.mubr.msk.bf16.mxu0 %vm1181_vm6, %v1174_v21  ;;  %v1651_v28 = vsel %vm1131_vm9, 1.0, %v2419_v4 }
 0x19c   : > { %v2044_v25 = vpop.eup %2043  ;;  %v1650_v29 = vsel %vm1130_vm10, 1.0, %v2419_v4  ;;  %1865 = vmatpush3.bf16.msra.mxu1 %v1862_v58 }
 0x19d   : > { %v2046_v26 = vpop.eup %2045  ;;  %v1105_v30 = vpop.permute.xlu1 %1104  ;;  %v1175_v34 = vpack.c.bf16 %v1651_v28, %v1650_v29 }
 0x19e   : > { %v1102_v31 = vpop.permute.xlu0 %1101  ;;  %vm1133_vm11 = vcmp.eq.s32.totalorder %v1105_v30, %v2848_v51  ;;  %1766 = vmatprep.mubr.msk.f32.mxu1 %vm634_vm1, %v2046_v26 }
 0x19f   : > { %vm1132_vm12 = vcmp.eq.s32.totalorder %v1102_v31, %v2848_v51  ;;  %v1653_v32 = vsel %vm1133_vm11, 1.0, %v2419_v4  ;;  %1767 = vmatmul.mubr.msk.f32.gmra.mrb[4].mxu1 %vm634_vm1, %v2044_v25 }
 0x1a0   : > { %v1652_v33 = vsel %vm1132_vm12, 1.0, %v2419_v4 }
 0x1a1   : > { %v1176_v35 = vpack.c.bf16 %v1653_v32, %v1652_v33  ;;  %v1111_v37 = vpop.permute.xlu1 %1110  ;;  %1808 = vmatmul.mubr.msk.bf16.gmra.mrb[16].mxu0 %vm1181_vm6, %v1175_v34 }
 0x1a2   : > { %v1108_v39 = vpop.permute.xlu0 %1107  ;;  %vm1135_vm13 = vcmp.eq.s32.totalorder %v1111_v37, %v2848_v51 }
 0x1a3   : > { %vm1134_vm14 = vcmp.eq.s32.totalorder %v1108_v39, %v2848_v51  ;;  %1811 = vmatprep.mubr.msk.bf16.mxu0 %vm1181_vm6, %v1176_v35  ;;  %v1655_v40 = vsel %vm1135_vm13, 1.0, %v2419_v4 }
 0x1a4   : > { %v1654_v41 = vsel %vm1134_vm14, 1.0, %v2419_v4 }
 0x1a5   : > { %v1117_v42 = vpop.permute.xlu1 %1116  ;;  %v1177_v46 = vpack.c.bf16 %v1655_v40, %v1654_v41 }
 0x1a6   : > { %v1114_v43 = vpop.permute.xlu0 %1113  ;;  %vm1137_vm15 = vcmp.eq.s32.totalorder %v1117_v42, %v2848_v51 }
 0x1a7   : > { %vm1136_vm0 = vcmp.eq.s32.totalorder %v1114_v43, %v2848_v51  ;;  %v1657_v44 = vsel %vm1137_vm15, 1.0, %v2419_v4 }
 0x1a8   : > { %v1656_v45 = vsel %vm1136_vm0, 1.0, %v2419_v4 }
 0x1a9   : > { %v1178_v47 = vpack.c.bf16 %v1657_v44, %v1656_v45  ;;  %v1123_v48 = vpop.permute.xlu1 %1122  ;;  %1812 = vmatmul.mubr.msk.bf16.gmra.mrb[20].mxu0 %vm1181_vm6, %v1177_v46  ;;  %v2420_v45 = vmov 0.0|0.0  }
 0x1aa   : > { %v1120_v49 = vpop.permute.xlu0 %1119  ;;  %vm1139_vm1 = vcmp.eq.s32.totalorder %v1123_v48, %v2848_v51  ;;  %1866 = vmatprep.subr.bf16.mxu1 %v2420_v45 }
 0x1ab   : > { %vm1138_vm2 = vcmp.eq.s32.totalorder %v1120_v49, %v2848_v51  ;;  %1815 = vmatprep.mubr.msk.bf16.mxu0 %vm1181_vm6, %v1178_v47  ;;  %v1659_v50 = vsel %vm1139_vm1, 1.0, %v2419_v4 }
 0x1ac   : > { %v1658_v52 = vsel %vm1138_vm2, 1.0, %v2419_v4 }
 0x1ad   : > { %v1179_v53 = vpack.c.bf16 %v1659_v50, %v1658_v52 }
 0x1b1   : > { %1816 = vmatmul.mubr.msk.bf16.gmra.mrb[24].mxu0 %vm1181_vm6, %v1179_v53 }
 0x258   : > { %v1747_v51 = vpop.f32.mrb[0].mxu0 }
 0x259   : > { %v749_v59 = vpop.f32.mrb[1].mxu0 }
 0x25a   : > { %2047 = vtanh.f32 %v749_v59 }
 0x25b   : > { %2049 = vtanh.f32 %v1747_v51 }
 0x25c   : > { %v1750_v60 = vpop.f32.mrb[2].mxu0 }
 0x25d   : > { %v759_v61 = vpop.f32.mrb[3].mxu0 }
 0x25e   : > { %2051 = vtanh.f32 %v759_v61 }
 0x25f   : > { %2053 = vtanh.f32 %v1750_v60 }
 0x260   : > { %v1753_v62 = vpop.f32.mrb[4].mxu0 }
 0x261   : > { %v769_v63 = vpop.f32.mrb[5].mxu0 }
 0x262   : > { %2055 = vtanh.f32 %v769_v63 }
 0x263   : > { %2057 = vtanh.f32 %v1753_v62 }
 0x264   : > { %v2048_v0 = vpop.eup %2047  ;;  %v1756_v38 = vpop.f32.mrb[6].mxu0 }
 0x265   : > { %v2050_v1 = vpop.eup %2049  ;;  %v779_v2 = vpop.f32.mrb[7].mxu0  ;;  %1777 = vmatprep.mubr.msk.f32.mxu1 %vm848_vm3, %v2048_v0 }
 0x266   : > { %2059 = vtanh.f32 %v779_v2  ;;  %1778 = vmatmul.mubr.msk.f32.vlgmr.msra.gmra.mrb[6].mxu1 %vm848_vm3, %v2050_v1 }
 0x267   : > { %2061 = vtanh.f32 %v1756_v38 }
 0x268   : > { %v2052_v3 = vpop.eup %2051  ;;  %v1759_v5 = vpop.f32.mrb[8].mxu0 }
 0x269   : > { %v2054_v6 = vpop.eup %2053  ;;  %v789_v7 = vpop.f32.mrb[9].mxu0  ;;  %1780 = vmatprep.mubr.msk.f32.mxu1 %vm848_vm3, %v2052_v3 }
 0x26a   : > { %v1762_v8 = vpop.f32.mrb[0].mxu1  ;;  %2063 = vtanh.f32 %v789_v7  ;;  %1781 = vmatmul.mubr.msk.f32.gmra.mrb[8].mxu1 %vm848_vm3, %v2054_v6 }
 0x26b   : > { %v799_v9 = vpop.f32.mrb[1].mxu1  ;;  %2065 = vtanh.f32 %v1759_v5 }
 0x26c   : > { %v2056_v10 = vpop.eup %2055  ;;  %2067 = vtanh.f32 %v799_v9  ;;  %v2909_v11 = vpop.f32.mrb[12].mxu0 }
 0x26d   : > { %v2058_v12 = vpop.eup %2057  ;;  %1783 = vmatprep.mubr.msk.f32.mxu1 %vm848_vm3, %v2056_v10  ;;  %v2912_v14 = vpop.f32.mrb[13].mxu0  ;;  %2069 = vtanh.f32 %v1762_v8 }
 0x26e   : > { %v1765_v13 = vpop.f32.mrb[2].mxu1  ;;  %1784 = vmatmul.mubr.msk.f32.gmra.mrb[10].mxu1 %vm848_vm3, %v2058_v12  ;;  %v2915_v16 = vpop.f32.mrb[14].mxu0 }
 0x26f   : > { %v809_v15 = vpop.f32.mrb[3].mxu1  ;;  %v1247_v17 = vpop.f32.mrb[15].mxu0 }
 0x270   : > { %2071 = vtanh.f32 %v809_v15  ;;  %v2060_v18 = vpop.eup %2059 }
 0x271   : > { %v2062_v19 = vpop.eup %2061  ;;  %1786 = vmatprep.mubr.msk.f32.mxu1 %vm848_vm3, %v2060_v18  ;;  %2073 = vtanh.f32 %v1765_v13 }
 0x272   : > { %v1768_v20 = vpop.f32.mrb[4].mxu1  ;;  %1787 = vmatmul.mubr.msk.f32.gmra.mrb[12].mxu1 %vm848_vm3, %v2062_v19 }
 0x273   : > { %v819_v21 = vpop.f32.mrb[5].mxu1 }
 0x274   : > { %2075 = vtanh.f32 %v819_v21  ;;  %v2064_v22 = vpop.eup %2063  ;;  %v2919_v23 = vpop.f32.mrb[16].mxu0 }
 0x275   : > { %v2066_v24 = vpop.eup %2065  ;;  %1789 = vmatprep.mubr.msk.f32.mxu1 %vm848_vm3, %v2064_v22  ;;  %v2922_v25 = vpop.f32.mrb[17].mxu0  ;;  %2077 = vtanh.f32 %v1768_v20 }
 0x276   : > { %v2068_v26 = vpop.eup %2067  ;;  %1790 = vmatmul.mubr.msk.f32.gmra.mrb[14].mxu1 %vm848_vm3, %v2066_v24  ;;  %v2925_v28 = vpop.f32.mrb[18].mxu0 }
 0x277   : > { %1792 = vmatprep.mubr.msk.f32.mxu1 %vm848_vm3, %v2068_v26  ;;  %v1263_v29 = vpop.f32.mrb[19].mxu0  ;;  %v2070_v30 = vpop.eup %2069 }
 0x27a   : > { %v2072_v31 = vpop.eup %2071  ;;  %1793 = vmatmul.mubr.msk.f32.gmra.mrb[16].mxu1 %vm848_vm3, %v2070_v30 }
 0x27b   : > { %1795 = vmatprep.mubr.msk.f32.mxu1 %vm848_vm3, %v2072_v31  ;;  %v2074_v32 = vpop.eup %2073 }
 0x27c   : > { %v2930_v33 = vpop.f32.mrb[20].mxu0 }
 0x27d   : > { %v2932_v35 = vpop.f32.mrb[21].mxu0 }
 0x27e   : > { %v2076_v34 = vpop.eup %2075  ;;  %1796 = vmatmul.mubr.msk.f32.gmra.mrb[18].mxu1 %vm848_vm3, %v2074_v32  ;;  %v2935_v37 = vpop.f32.mrb[22].mxu0 }
 0x27f   : > { %1798 = vmatprep.mubr.msk.f32.mxu1 %vm848_vm3, %v2076_v34  ;;  %v2938_v39 = vpop.f32.mrb[23].mxu0  ;;  %v2078_v40 = vpop.eup %2077 }
 0x282   : > { %1799 = vmatmul.mubr.msk.f32.gmra.mrb[20].mxu1 %vm848_vm3, %v2078_v40 }
 0x283   : > { %1851 = vmatprep.mubr.msk.f32.mxu1 %vm2421_vm4, %v2419_v4 }
 0x284   : > { %v2941_v41 = vpop.f32.mrb[24].mxu0 }
 0x285   : > { %v2943_v42 = vpop.f32.mrb[25].mxu0 }
 0x286   : > { %v2945_v43 = vpop.f32.mrb[26].mxu0 }
 0x287   : > { %v2947_v44 = vpop.f32.mrb[27].mxu0 }
 0x339   : > { %v1779_v46 = vpop.f32.mrb[6].mxu1 }
 0x33a   : > { %2079 = vtanh.f32 %v1779_v46  ;;  %v963_v47 = vpop.f32.mrb[7].mxu1 }
 0x33b   : > { %2081 = vtanh.f32 %v963_v47 }
 0x33d   : > { %v1782_v48 = vpop.f32.mrb[8].mxu1 }
 0x33e   : > { %2083 = vtanh.f32 %v1782_v48  ;;  %v973_v49 = vpop.f32.mrb[9].mxu1 }
 0x33f   : > { %2085 = vtanh.f32 %v973_v49 }
 0x341   : > { %v1785_v50 = vpop.f32.mrb[10].mxu1 }
 0x342   : > { %2087 = vtanh.f32 %v1785_v50  ;;  %v983_v52 = vpop.f32.mrb[11].mxu1 }
 0x343   : > { %2089 = vtanh.f32 %v983_v52 }
 0x344   : > { %v2080_v53 = vpop.eup %2079 }
 0x345   : > { %v2082_v27 = vpop.eup %2081  ;;  %v1788_v54 = vpop.f32.mrb[12].mxu1  ;;  %v1308_v55 = vmul.f32 %v2080_v53, %v1247_v17 }
 0x346   : > { %2091 = vtanh.f32 %v1788_v54  ;;  %v993_v56 = vpop.f32.mrb[13].mxu1  ;;  %v1307_v4 = vmul.f32 %v2082_v27, %v2912_v14 }
 0x347   : > { %2093 = vtanh.f32 %v993_v56 }
 0x348   : > { %v2084_v57 = vpop.eup %2083  ;;  %v1867_v58 = vpack.c.bf16 %v1308_v55, %v1307_v4 }
 0x349   : > { %v2086_v51 = vpop.eup %2085  ;;  %v1791_v59 = vpop.f32.mrb[14].mxu1  ;;  %v1310_v60 = vmul.f32 %v2084_v57, %v2915_v16 }
 0x34a   : > { %2095 = vtanh.f32 %v1791_v59  ;;  %v1003_v61 = vpop.f32.mrb[15].mxu1  ;;  %1868 = vmatpush3.bf16.msra.mxu1 %v1867_v58  ;;  %v1309_v62 = vmul.f32 %v2086_v51, %v2909_v11 }
 0x34b   : > { %2097 = vtanh.f32 %v1003_v61  ;;  %1869 = vmatprep.subr.bf16.mxu1 %v2420_v45 }
 0x34c   : > { %v2088_v63 = vpop.eup %2087  ;;  %v1870_v0 = vpack.c.bf16 %v1310_v60, %v1309_v62 }
 0x34d   : > { %v2090_v38 = vpop.eup %2089  ;;  %v1794_v1 = vpop.f32.mrb[16].mxu1  ;;  %v1312_v2 = vmul.f32 %v2088_v63, %v1263_v29 }
 0x34e   : > { %2099 = vtanh.f32 %v1794_v1  ;;  %v1013_v3 = vpop.f32.mrb[17].mxu1  ;;  %1871 = vmatpush3.bf16.msra.mxu1 %v1870_v0  ;;  %v1311_v5 = vmul.f32 %v2090_v38, %v2922_v25 }
 0x34f   : > { %2101 = vtanh.f32 %v1013_v3  ;;  %1872 = vmatprep.subr.bf16.mxu1 %v2420_v45 }
 0x350   : > { %v2092_v6 = vpop.eup %2091  ;;  %v1873_v7 = vpack.c.bf16 %v1312_v2, %v1311_v5 }
 0x351   : > { %v2094_v8 = vpop.eup %2093  ;;  %v1797_v9 = vpop.f32.mrb[18].mxu1  ;;  %v1314_v10 = vmul.f32 %v2092_v6, %v2925_v28 }
 0x352   : > { %2103 = vtanh.f32 %v1797_v9  ;;  %v1023_v11 = vpop.f32.mrb[19].mxu1  ;;  %1874 = vmatpush3.bf16.msra.mxu1 %v1873_v7  ;;  %v1313_v12 = vmul.f32 %v2094_v8, %v2919_v23 }
 0x353   : > { %2105 = vtanh.f32 %v1023_v11  ;;  %1875 = vmatprep.subr.bf16.mxu1 %v2420_v45 }
 0x354   : > { %v2096_v13 = vpop.eup %2095  ;;  %v1876_v14 = vpack.c.bf16 %v1314_v10, %v1313_v12 }
 0x355   : > { %v2098_v15 = vpop.eup %2097  ;;  %v1800_v16 = vpop.f32.mrb[20].mxu1  ;;  %v1316_v17 = vmul.f32 %v2096_v13, %v2938_v39  ;;  %v1668_v39 = vld [vmem:[%s378_s16] ss:$0 sm:$0xff] }
 0x356   : > { %2107 = vtanh.f32 %v1800_v16  ;;  %v1033_v18 = vpop.f32.mrb[21].mxu1  ;;  %1877 = vmatpush3.bf16.msra.mxu1 %v1876_v14  ;;  %v1315_v19 = vmul.f32 %v2098_v15, %v2932_v35 }
 0x357   : > { %2109 = vtanh.f32 %v1033_v18  ;;  %1878 = vmatprep.subr.bf16.mxu1 %v2420_v45 }
 0x358   : > { %v2100_v20 = vpop.eup %2099  ;;  %v1879_v21 = vpack.c.bf16 %v1316_v17, %v1315_v19 }
 0x359   : > { %v2102_v22 = vpop.eup %2101  ;;  %v1318_v23 = vmul.f32 %v2100_v20, %v2935_v37  ;;  %v1324_v37 = vshrl.u32 %v1058_v36, 7 }
 0x35a   : > { %1880 = vmatpush3.bf16.msra.mxu1 %v1879_v21  ;;  %v1317_v24 = vmul.f32 %v2102_v22, %v2930_v33 }
 0x35b   : > { %1881 = vmatprep.subr.bf16.mxu1 %v2420_v45  ;;  %vm1330_vm5 = vcmp.eq.s32.totalorder %v1668_v39, %v1324_v37 }
 0x35c   : > { %v2104_v25 = vpop.eup %2103  ;;  %v1882_v26 = vpack.c.bf16 %v1318_v23, %v1317_v24 }
 0x35d   : > { %v2106_v28 = vpop.eup %2105  ;;  %v1320_v29 = vmul.f32 %v2104_v25, %v2947_v44 }
 0x35e   : > { %1883 = vmatpush3.bf16.msra.mxu1 %v1882_v26  ;;  %v1319_v30 = vmul.f32 %v2106_v28, %v2943_v42  ;;  %v2422_v42 = vmov 1.0  }
 0x35f   : > { %1884 = vmatprep.subr.bf16.mxu1 %v2420_v45 }
 0x360   : > { %v2108_v31 = vpop.eup %2107  ;;  %v1885_v32 = vpack.c.bf16 %v1320_v29, %v1319_v30 }
 0x361   : > { %v2110_v34 = vpop.eup %2109  ;;  %v1322_v33 = vmul.f32 %v2108_v31, %v2945_v43 }
 0x362   : > { %1886 = vmatpush3.bf16.msra.mxu1 %v1885_v32  ;;  %v1321_v35 = vmul.f32 %v2110_v34, %v2941_v41 }
 0x363   : > { %1887 = vmatprep.subr.bf16.mxu1 %v2420_v45 }
 0x364   : > { %v1888_v40 = vpack.c.bf16 %v1322_v33, %v1321_v35 }
 0x366   : > { %1889 = vmatpush3.bf16.msra.mxu1 %v1888_v40 }
 0x369   : > { %1852 = vmatmul.mubr.msk.f32.vlgmr.msra.gmra.mrb[22].mxu1 %vm1330_vm5, %v2422_v42 }
 0x43c   : > { %v1399_v36 = vpop.f32.mrb[22].mxu1 }
 0x43d   : > { %1407 = vst.msk [vmem:[%s442_s24] sm:$0xff] %vm848_vm3, %v1399_v36  ;;  %v1853_v41 = vpop.f32.mrb[23].mxu1 }
 0x43e   : > { %2326 = shalt.err (!%p2323_p7)
}
 0x43f   : > { %s2327_s15 = scalar_lea.hbm %s2980_s14, 128  ;;  %s2331_s20 = scalar_lea.hbm %s3037_s7, 256 }
 0x440   : > { %p2328_p8 = scmp.ne.s32.totalorder %s2980_s14, %s2327_s15  ;;  %p2332_p9 = scmp.lt.u32.totalorder %s2980_s14, %s3037_s7 }
 0x441   : > { %p2333_p3 = scmp.lt.u32.totalorder %s2331_s20, %s2327_s15  ;;  %p2335_p12 = scmp.lt.u32.totalorder %s2327_s15, %s2980_s14 }
 0x442   : > { %p2329_p10 = pnand %p2328_p8, %p3096_p1 }
 0x443   : > { %p2334_p11 = por %p2333_p3, %p2332_p9 }
 0x444   : > { %p2330_p13 = pneg %p2329_p10 }
 0x445   : > { %p2336_p6 = por %p2335_p12, %p2334_p11 }
 0x447   : > { %p2337_p4 = pnand %p2336_p6, %p2330_p13 }
 0x449   : > { %2340 = shalt.err (!%p2337_p4)
}
 0x44a   : > { %1915 = dma.vmem_to_hbm [thread:$0]  (%p3096_p1), %s2982_s29, 128, %s2980_s14, %s1416_s12  }
 0x44b PF: > { %s3097_s26 = sld [smem:[#allocation20_spill]]  ;;  %s3098_s8 = sld [smem:[#allocation25_spill]] }
 0x44c   : > { %s3099_s21 = sld [smem:[#allocation22_spill]] }
 0x451   : > { %s1441_s16 = sand.u32 1, %s3097_s26   ;;  %p3100_p0 = scmp.ne.s32.totalorder %s3098_s8, 0 }
 0x452   : > { %p3101_p5 = scmp.ge.s32.totalorder %s3099_s21, 2  ;;  %s1442_s5 = scalar_lea.sflag [#allocation4], %s1441_s16 }
 0x454   : > { %p1941_p2 = pnand %p3101_p5, %p3100_p0 }
 0x456   : > { %2382 = dma.done.wait (!%p1941_p2), %s1442_s5, 128  }
 0x457   : > { %2384 = vsyncadd (!%p1941_p2), %s1442_s5, 4294967168  ;;  %s28_s29 = sadd.s32 1, %s3099_s21   ;;  %s3102_s30 = sld [smem:[#allocation21_spill]] }
 0x458   : > { %p25_p7 = scmp.ge.s32.totalorder %s28_s29, 4   ;;  %s3103_s26 = sld [smem:[#allocation24_spill]] }
 0x459   : > { %s3104_s18 = sld [smem:[#allocation23_spill]]  ;;  %s3105_s24 = smov %s2391_s25 }
 0x45a   : > { %s3107_s27 = smov %s2403_s28  ;;  %27 = sbr.rel (!%p25_p7) target bundleno = 14 (0xe), region = 141 }
 0x45d   : > { %s3106_s25 = smov %s3102_s30 }
 0x45f   : > { %s3108_s28 = smov %s3104_s18 }
 0x461   :  { %1447 = vsyncpa [#allocation3], 1 }
 0x462   :  { %1449 = vsyncpa [#allocation3 + $0x1], 1 }
 0x463   :  { %1450 = vsyncpa [#allocation6], 1 }
 0x464   :  { %1452 = vsyncpa [#allocation6 + $0x1], 1 }
 0x465   :  { %1453 = vsyncpa [#allocation9], 1 }
 0x466   :  { %1454 = vsyncpa [#allocation12], 1 }
 0x467   :  { %1455 = vsyncpa [#allocation4], 1 }
 0x468   :  { %1457 = vsyncpa [#allocation4 + $0x1], 1 }

</bundles_post_ra>
